<compile_context>
chip_gen: v5e
topology: v5e:2x2
jax: 0.10.0
libtpu: 0.0.40
codegen_flags: <defaults>
</compile_context>

<pallas_src>
import jax
import jax.numpy as jnp
from jax.experimental import pallas as pl
from jax.experimental.pallas import tpu as pltpu

STATE_DIM = 32
ACTION_DIM = 8
H1 = 256
H2 = 128


def _round_up(n, m):
    return ((n + m - 1) // m) * m


def policy_kernel(x_ref, w1_ref, b1_ref, w2_ref, b2_ref, w3_ref, b3_ref, o_ref):
    # fc1 + relu : bf16 MXU matmul, f32 accumulate; bias/relu in f32 (VPU).
    h1 = jnp.dot(x_ref[...], w1_ref[...], preferred_element_type=jnp.float32)
    h1 = jnp.maximum(h1 + b1_ref[...], 0.0)
    # fc2 + relu : re-cast activations to bf16 only at the MXU boundary.
    h2 = jnp.dot(h1.astype(w2_ref.dtype), w2_ref[...],
                 preferred_element_type=jnp.float32)
    h2 = jnp.maximum(h2 + b2_ref[...], 0.0)
    # fc3 + 2*tanh : tanh in f32 on the EUP.
    h3 = jnp.dot(h2.astype(w3_ref.dtype), w3_ref[...],
                 preferred_element_type=jnp.float32)
    o_ref[...] = (2.0 * jnp.tanh(h3 + b3_ref[...])).astype(o_ref.dtype)


def policy_forward(state, params, *, tile_b=256):
    w1, b1, w2, b2, w3, b3 = params
    batch, state_dim = state.shape
    action_dim = w3.shape[1]

    # bf16 inputs for the MXU; biases stay f32 for f32 elementwise math.
    x = state.astype(jnp.bfloat16)
    w1b, w2b, w3b = (w.astype(jnp.bfloat16) for w in (w1, w2, w3))
    b1f, b2f, b3f = (b.astype(jnp.float32) for b in (b1, b2, b3))

    # Batch tile: multiple of 8 sublanes, capped at tile_b; pad batch to a
    # whole number of tiles (padded rows are masked out on store / sliced off).
    tb = min(tile_b, _round_up(batch, 8))
    padded = _round_up(batch, tb)
    if padded != batch:
        x = jnp.pad(x, ((0, padded - batch), (0, 0)))
    grid = (padded // tb,)

    const = lambda i: (0, 0)           # weights/biases: resident across steps
    tiled = lambda i: (i, 0)           # state/output: one batch tile per step

    flops = 2 * padded * (state_dim * H1 + H1 * H2 + H2 * action_dim)
    bytes_accessed = (
        x.size * x.dtype.itemsize
        + sum(int(a.size) * a.dtype.itemsize
              for a in (w1b, w2b, w3b, b1f, b2f, b3f))
        + padded * action_dim * 4
    )
    cost = pl.CostEstimate(flops=flops,
                           transcendentals=padded * action_dim,
                           bytes_accessed=bytes_accessed)

    out = pl.pallas_call(
        policy_kernel,
        out_shape=jax.ShapeDtypeStruct((padded, action_dim), jnp.float32),
        grid_spec=pltpu.PrefetchScalarGridSpec(
            num_scalar_prefetch=0,
            grid=grid,
            in_specs=[
                pl.BlockSpec((tb, state_dim), tiled),      # state tile
                pl.BlockSpec((state_dim, H1), const),      # w1
                pl.BlockSpec((1, H1), const),              # b1
                pl.BlockSpec((H1, H2), const),             # w2
                pl.BlockSpec((1, H2), const),              # b2
                pl.BlockSpec((H2, action_dim), const),     # w3
                pl.BlockSpec((1, action_dim), const),      # b3
            ],
            out_specs=pl.BlockSpec((tb, action_dim), tiled),
        ),
        compiler_params=pltpu.CompilerParams(
            dimension_semantics=("parallel",),
        ),
        cost_estimate=cost,
    )(x, w1b, b1f, w2b, b2f, w3b, b3f)

    return out[:batch]


def init_params(key, state_dim=STATE_DIM, action_dim=ACTION_DIM):
    """Deterministic synthetic init (uniform like PyTorch's default Linear init)."""
    keys = jax.random.split(key, 6)

    def lin(kw, kb, fan_in, fan_out):
        bound = 1.0 / jnp.sqrt(fan_in)
        w = jax.random.uniform(kw, (fan_in, fan_out), jnp.float32, -bound, bound)
        b = jax.random.uniform(kb, (1, fan_out), jnp.float32, -bound, bound)
        return w, b

    w1, b1 = lin(keys[0], keys[1], state_dim, H1)
    w2, b2 = lin(keys[2], keys[3], H1, H2)
    w3, b3 = lin(keys[4], keys[5], H2, action_dim)
    return (w1, b1, w2, b2, w3, b3)


def policy_reference_f32(state, params):
    """Exact f32 semantics of the PyTorch module."""
    w1, b1, w2, b2, w3, b3 = params
    x = jnp.maximum(state @ w1 + b1, 0.0)
    x = jnp.maximum(x @ w2 + b2, 0.0)
    return 2.0 * jnp.tanh(x @ w3 + b3)


def policy_reference_bf16(state, params):
    """Same bf16-weight / f32-accumulate recipe as the kernel, in plain JAX."""
    w1, b1, w2, b2, w3, b3 = params
    x = state.astype(jnp.bfloat16)
    h1 = jnp.maximum(
        jnp.dot(x, w1.astype(jnp.bfloat16), preferred_element_type=jnp.float32) + b1, 0.0)
    h2 = jnp.maximum(
        jnp.dot(h1.astype(jnp.bfloat16), w2.astype(jnp.bfloat16),
                preferred_element_type=jnp.float32) + b2, 0.0)
    h3 = jnp.dot(h2.astype(jnp.bfloat16), w3.astype(jnp.bfloat16),
                 preferred_element_type=jnp.float32) + b3
    return 2.0 * jnp.tanh(h3)


if __name__ == "__main__":
    key = jax.random.PRNGKey(0)
    k_param, k_state = jax.random.split(key)

    batch = 512  # two 256-row tiles -> exercises the batch grid + parallel axis
    params = init_params(k_param)
    state = jax.random.normal(k_state, (batch, STATE_DIM), jnp.float32)

    out = policy_forward(state, params)
    jax.block_until_ready(out)
    assert out.shape == (batch, ACTION_DIM)

    # Strict check vs. a bf16-weight reference (same numerics recipe).
    ref_bf16 = policy_reference_bf16(state, params)
    assert jnp.allclose(out, ref_bf16, atol=1e-2, rtol=1e-2), \
        "mismatch vs bf16-weight JAX reference"

    # Loose check vs. the exact f32 module semantics (bf16 weight quantization).
    ref_f32 = policy_reference_f32(state, params)
    assert jnp.allclose(out, ref_f32, atol=5e-2, rtol=5e-2), \
        "mismatch vs f32 JAX reference"

    # Also exercise a tiny, non-tile-aligned batch (padding path).
    small = jax.random.normal(jax.random.PRNGKey(1), (7, STATE_DIM), jnp.float32)
    out_small = policy_forward(small, params)
    jax.block_until_ready(out_small)
    assert out_small.shape == (7, ACTION_DIM)
    assert jnp.allclose(out_small, policy_reference_f32(small, params),
                        atol=5e-2, rtol=5e-2), "mismatch on small batch"

    print("KERNEL_OK")
</pallas_src>

<mosaic_0001>
module attributes {stable_mosaic.version = 11 : i64} {
  func.func @policy_kernel(%arg0: i32, %arg1: memref<256x32xbf16, #tpu.memory_space<vmem>>, %arg2: memref<32x256xbf16, #tpu.memory_space<vmem>>, %arg3: memref<1x256xf32, #tpu.memory_space<vmem>>, %arg4: memref<256x128xbf16, #tpu.memory_space<vmem>>, %arg5: memref<1x128xf32, #tpu.memory_space<vmem>>, %arg6: memref<128x8xbf16, #tpu.memory_space<vmem>>, %arg7: memref<1x8xf32, #tpu.memory_space<vmem>>, %arg8: memref<256x8xf32, #tpu.memory_space<vmem>>) attributes {dimension_semantics = [#tpu.dimension_semantics<parallel>], iteration_bounds = array<i64: 2>, scalar_prefetch = 0 : i64, scratch_operands = 0 : i64, tpu.core_type = #tpu.core_type<tc>, window_params = [{transform_indices = @transform_0, window_bounds = array<i64: 256, 32>}, {pipeline_mode = #tpu.pipeline_mode<synchronous>, transform_indices = @transform_1, window_bounds = array<i64: 32, 256>}, {pipeline_mode = #tpu.pipeline_mode<synchronous>, transform_indices = @transform_2, window_bounds = array<i64: 1, 256>}, {pipeline_mode = #tpu.pipeline_mode<synchronous>, transform_indices = @transform_3, window_bounds = array<i64: 256, 128>}, {pipeline_mode = #tpu.pipeline_mode<synchronous>, transform_indices = @transform_4, window_bounds = array<i64: 1, 128>}, {pipeline_mode = #tpu.pipeline_mode<synchronous>, transform_indices = @transform_5, window_bounds = array<i64: 128, 8>}, {pipeline_mode = #tpu.pipeline_mode<synchronous>, transform_indices = @transform_6, window_bounds = array<i64: 1, 8>}, {transform_indices = @transform_7, window_bounds = array<i64: 256, 8>}]} {
    %c0 = arith.constant 0 : index
    %c0_0 = arith.constant 0 : index
    %0 = vector.load %arg1[%c0, %c0_0] : memref<256x32xbf16, #tpu.memory_space<vmem>>, vector<256x32xbf16>
    %c0_1 = arith.constant 0 : index
    %c0_2 = arith.constant 0 : index
    %1 = vector.load %arg2[%c0_1, %c0_2] : memref<32x256xbf16, #tpu.memory_space<vmem>>, vector<32x256xbf16>
    %cst = arith.constant dense<0.000000e+00> : vector<256x256xf32>
    %2 = tpu.matmul %0, %1, %cst {dimension_numbers = #tpu.dot_dimension_numbers<[1], [0], [0], [1], [0, 0, 1, 1], [], []>} : vector<256x32xbf16>, vector<32x256xbf16>, vector<256x256xf32> -> vector<256x256xf32>
    %c0_3 = arith.constant 0 : index
    %c0_4 = arith.constant 0 : index
    %3 = vector.load %arg3[%c0_3, %c0_4] : memref<1x256xf32, #tpu.memory_space<vmem>>, vector<1x256xf32>
    %4 = vector.broadcast %3 : vector<1x256xf32> to vector<256x256xf32>
    %5 = arith.addf %2, %4 : vector<256x256xf32>
    %cst_5 = arith.constant 0.000000e+00 : f32
    %6 = vector.broadcast %cst_5 : f32 to vector<256x256xf32>
    %7 = arith.maximumf %5, %6 : vector<256x256xf32>
    %8 = arith.truncf %7 : vector<256x256xf32> to vector<256x256xbf16>
    %c0_6 = arith.constant 0 : index
    %c0_7 = arith.constant 0 : index
    %9 = vector.load %arg4[%c0_6, %c0_7] : memref<256x128xbf16, #tpu.memory_space<vmem>>, vector<256x128xbf16>
    %cst_8 = arith.constant dense<0.000000e+00> : vector<256x128xf32>
    %10 = tpu.matmul %8, %9, %cst_8 {dimension_numbers = #tpu.dot_dimension_numbers<[1], [0], [0], [1], [0, 0, 1, 1], [], []>} : vector<256x256xbf16>, vector<256x128xbf16>, vector<256x128xf32> -> vector<256x128xf32>
    %c0_9 = arith.constant 0 : index
    %c0_10 = arith.constant 0 : index
    %11 = vector.load %arg5[%c0_9, %c0_10] : memref<1x128xf32, #tpu.memory_space<vmem>>, vector<1x128xf32>
    %12 = vector.broadcast %11 : vector<1x128xf32> to vector<256x128xf32>
    %13 = arith.addf %10, %12 : vector<256x128xf32>
    %cst_11 = arith.constant 0.000000e+00 : f32
    %14 = vector.broadcast %cst_11 : f32 to vector<256x128xf32>
    %15 = arith.maximumf %13, %14 : vector<256x128xf32>
    %16 = arith.truncf %15 : vector<256x128xf32> to vector<256x128xbf16>
    %c0_12 = arith.constant 0 : index
    %c0_13 = arith.constant 0 : index
    %17 = vector.load %arg6[%c0_12, %c0_13] : memref<128x8xbf16, #tpu.memory_space<vmem>>, vector<128x8xbf16>
    %cst_14 = arith.constant dense<0.000000e+00> : vector<256x8xf32>
    %18 = tpu.matmul %16, %17, %cst_14 {dimension_numbers = #tpu.dot_dimension_numbers<[1], [0], [0], [1], [0, 0, 1, 1], [], []>} : vector<256x128xbf16>, vector<128x8xbf16>, vector<256x8xf32> -> vector<256x8xf32>
    %c0_15 = arith.constant 0 : index
    %c0_16 = arith.constant 0 : index
    %19 = vector.load %arg7[%c0_15, %c0_16] : memref<1x8xf32, #tpu.memory_space<vmem>>, vector<1x8xf32>
    %20 = vector.broadcast %19 : vector<1x8xf32> to vector<256x8xf32>
    %21 = arith.addf %18, %20 : vector<256x8xf32>
    %22 = math.tanh %21 : vector<256x8xf32>
    %cst_17 = arith.constant 2.000000e+00 : f32
    %23 = vector.broadcast %cst_17 : f32 to vector<256x8xf32>
    %24 = arith.mulf %23, %22 : vector<256x8xf32>
    %c0_18 = arith.constant 0 : index
    %c0_19 = arith.constant 0 : index
    %25 = vector.load %arg8[%c0_18, %c0_19] : memref<256x8xf32, #tpu.memory_space<vmem>>, vector<256x8xf32>
    tpu.vector_store %arg8[%c0_18, %c0_19], %24 {strides = array<i32>} : memref<256x8xf32, #tpu.memory_space<vmem>>, vector<256x8xf32>,
    return
  }
  func.func @transform_0(%arg0: i32) -> (i32, i32) {
    %c0_i32 = arith.constant 0 : i32
    %c0_i32_0 = arith.constant 0 : i32
    return %arg0, %c0_i32 : i32, i32
  }
  func.func @transform_1(%arg0: i32) -> (i32, i32) {
    %c0_i32 = arith.constant 0 : i32
    %c0_i32_0 = arith.constant 0 : i32
    %c0_i32_1 = arith.constant 0 : i32
    return %c0_i32, %c0_i32_0 : i32, i32
  }
  func.func @transform_2(%arg0: i32) -> (i32, i32) {
    %c0_i32 = arith.constant 0 : i32
    %c0_i32_0 = arith.constant 0 : i32
    %c0_i32_1 = arith.constant 0 : i32
    return %c0_i32, %c0_i32_0 : i32, i32
  }
  func.func @transform_3(%arg0: i32) -> (i32, i32) {
    %c0_i32 = arith.constant 0 : i32
    %c0_i32_0 = arith.constant 0 : i32
    %c0_i32_1 = arith.constant 0 : i32
    return %c0_i32, %c0_i32_0 : i32, i32
  }
  func.func @transform_4(%arg0: i32) -> (i32, i32) {
    %c0_i32 = arith.constant 0 : i32
    %c0_i32_0 = arith.constant 0 : i32
    %c0_i32_1 = arith.constant 0 : i32
    return %c0_i32, %c0_i32_0 : i32, i32
  }
  func.func @transform_5(%arg0: i32) -> (i32, i32) {
    %c0_i32 = arith.constant 0 : i32
    %c0_i32_0 = arith.constant 0 : i32
    %c0_i32_1 = arith.constant 0 : i32
    return %c0_i32, %c0_i32_0 : i32, i32
  }
  func.func @transform_6(%arg0: i32) -> (i32, i32) {
    %c0_i32 = arith.constant 0 : i32
    %c0_i32_0 = arith.constant 0 : i32
    %c0_i32_1 = arith.constant 0 : i32
    return %c0_i32, %c0_i32_0 : i32, i32
  }
  func.func @transform_7(%arg0: i32) -> (i32, i32) {
    %c0_i32 = arith.constant 0 : i32
    %c0_i32_0 = arith.constant 0 : i32
    return %arg0, %c0_i32 : i32, i32
  }
}

</mosaic_0001>

<bundles_post_ra>
// kernel: tpu_custom_call.1
= control target key start
LH: loop header
LB: loop body
LE: loop exit
PB: predicated region body
PF: predicated region fallthrough
CT: control target
= control target key end

     0   :  { %s1815_s24 = smov 0   ;;  %s2283_s0 = inlined_call_operand.vmem [shape: bf16[512,32], index: 0, kind: input, shape index: {}]   ;;  %s2284_s1 = inlined_call_operand.vmem [shape: bf16[32,256], index: 1, kind: input, shape index: {}]   ;;  %s2285_s2 = inlined_call_operand.vmem [shape: f32[1,256], index: 2, kind: input, shape index: {}]   ;;  %s2286_s3 = inlined_call_operand.vmem [shape: bf16[256,128], index: 3, kind: input, shape index: {}]   ;;  %s2287_s4 = inlined_call_operand.vmem [shape: f32[1,128], index: 4, kind: input, shape index: {}]   ;;  %s2288_s5 = inlined_call_operand.vmem [shape: bf16[128,8], index: 5, kind: input, shape index: {}]   ;;  %s2289_s6 = inlined_call_operand.vmem [shape: f32[1,8], index: 6, kind: input, shape index: {}]   ;;  %s2290_s7 = inlined_call_operand.vmem [shape: f32[512,8], index: 7, kind: output, shape index: {}]  }
   0x1 LB: > { %s1416_s25 = sadd.s32 4294967295, %s1773_s24   ;;  %p1420_p0 = scmp.ge.s32.totalorder %s1773_s24, 1  ;;  %s1773_s24 = sphi %s1815_s24, %s17_s24  }
   0x2   : > { %p238_p1 = scmp.lt.s32.totalorder %s1773_s24, 3 }
   0x4   : > { %p239_p2 = pnand %p1420_p0, %p238_p1 }
   0x5   : > { %s1421_s11 = sshll.u32 (!%p239_p2), %s1416_s25, 5 }
   0x6   : > { %242 = sbr.rel (%p239_p2) target bundleno = 779 (0x30b), region = 48  ;;  %p271_p3 = scmp.lt.s32.totalorder (!%p239_p2), %s1421_s11, 63 }
   0xb   : > { %v1499_v0 = vld [vmem:[%s2284_s1 + $0x10] sm:$0xf]  ;;  %v1654_v1 = vld [vmem:[%s2284_s1 + $0x14] sm:$0xf0]  ;;  %v1491_v2 = vld [vmem:[%s2284_s1] sm:$0xf] }
   0xc   : > { %v1500_v3 = vor.u32 %v1654_v1, %v1499_v0  ;;  %v1652_v4 = vld [vmem:[%s2284_s1 + $0x4] sm:$0xf0]  ;;  %v1653_v5 = vld [vmem:[%s2284_s1 + $0x14] sm:$0xf]  ;;  %v1501_v6 = vld [vmem:[%s2284_s1 + $0x18] sm:$0xf0] }
   0xd   : > { %v1492_v7 = vor.u32 %v1652_v4, %v1491_v2  ;;  %s2292_s11 = smov (!%p271_p3, %s1421_s11), 63  ;;  %v1504_v8 = vor.u32 %v1653_v5, %v1501_v6  ;;  %vm425_vm0 = vcmask 261120   ;;  %v1651_v11 = vld [vmem:[%s2284_s1 + $0x4] sm:$0xf]  ;;  %v1493_v12 = vld [vmem:[%s2284_s1 + $0x8] sm:$0xf0] }
   0xe   : > { %480 = vmatpush.bf16.msra.mxu0 %v1500_v3  ;;  %1679 = vmatpush.bf16.msra.mxu1 %v1500_v3  ;;  %s1422_s16 = sshll.u32 %s2292_s11, 2  ;;  %v1496_v13 = vor.u32 %v1651_v11, %v1493_v12  ;;  %v1662_v23 = vld [vmem:[%s2286_s3 + $0x38] sm:$0xff]  ;;  %v1661_v24 = vld [vmem:[%s2286_s3 + $0x30] sm:$0xff]  ;;  %v1660_v26 = vld [vmem:[%s2286_s3 + $0x28] sm:$0xff]  ;;  %s1424_s15 = sshll.u32 %s2292_s11, 3  ;;  %vm1327_vm1 = vcmask 64512  }
   0xf   : > { %1680 = vmatpush.bf16.msra.mxu2 %v1500_v3  ;;  %1681 = vmatpush.bf16.msra.mxu3 %v1500_v3  ;;  %s1847_s19 = scalar_lea.vmem %s2283_s0, %s1422_s16  ;;  %v1659_v27 = vld [vmem:[%s2286_s3 + $0x20] sm:$0xff]  ;;  %v1658_v28 = vld [vmem:[%s2286_s3 + $0x18] sm:$0xff]  ;;  %v1657_v29 = vld [vmem:[%s2286_s3 + $0x10] sm:$0xff]  ;;  %s2170_s18 = scalar_lea.vmem %s2290_s7, %s1424_s15 }
  0x10   : > { %v1635_v9 = vld [vmem:[%s1847_s19] sm:$0xff]  ;;  %v1851_v10 = vld [vmem:[%s1847_s19 + $0x28] sm:$0xff]  ;;  %v1864_v15 = vld [vmem:[%s1847_s19 + $0x30] sm:$0xff] }
  0x11   : > { %v1636_v14 = vld [vmem:[%s1847_s19 + $0x8] sm:$0xff]  ;;  %v1637_v16 = vld [vmem:[%s1847_s19 + $0x10] sm:$0xff]  ;;  %v1871_v17 = vld [vmem:[%s1847_s19 + $0x38] sm:$0xff] }
  0x12   : > { %481 = vmatpush.bf16.msra.mxu0 %v1492_v7  ;;  %1682 = vmatpush.bf16.msra.mxu1 %v1492_v7  ;;  %v1638_v18 = vld [vmem:[%s1847_s19 + $0x18] sm:$0xff]  ;;  %v1878_v19 = vld [vmem:[%s1847_s19 + $0x40] sm:$0xff]  ;;  %v1885_v21 = vld [vmem:[%s1847_s19 + $0x48] sm:$0xff] }
  0x13   : > { %1683 = vmatpush.bf16.msra.mxu2 %v1492_v7  ;;  %1684 = vmatpush.bf16.msra.mxu3 %v1492_v7  ;;  %v1639_v20 = vld [vmem:[%s1847_s19 + $0x20] sm:$0xff]  ;;  %v1891_v22 = vld [vmem:[%s1847_s19 + $0x50] sm:$0xff]  ;;  %v1903_v25 = vld [vmem:[%s1847_s19 + $0x58] sm:$0xff] }
  0x14   : > { %v1656_v30 = vld [vmem:[%s2286_s3 + $0x8] sm:$0xff]  ;;  %v1655_v31 = vld [vmem:[%s2286_s3] sm:$0xff]  ;;  %v1670_v33 = vld [vmem:[%s2286_s3 + $0x78] sm:$0xff] }
  0x15   : > { %1505 = vmatmul.msk.bf16.vlgmr.msra.gmra.mxu0 %vm425_vm0, %v1635_v9  ;;  %1510 = vmatmul.msk.bf16.vlgmr.msra.gmra.mxu1 %vm425_vm0, %v1851_v10  ;;  %v1928_v32 = vld [vmem:[%s1847_s19 + $0x60] sm:$0xff]  ;;  %v1945_v38 = vld [vmem:[%s1847_s19 + $0x68] sm:$0xff]  ;;  %v1669_v39 = vld [vmem:[%s2286_s3 + $0x70] sm:$0xff] }
  0x16   : > { %569 = vmatpush.bf16.msrb.mxu1 %v1504_v8  ;;  %1515 = vmatmul.msk.bf16.vlgmr.msra.gmra.mxu2 %vm425_vm0, %v1891_v22  ;;  %v1938_v34 = vld [vmem:[%s2285_s2] sm:$0x3]  ;;  %v1668_v52 = vld [vmem:[%s2286_s3 + $0x68] sm:$0xff]  ;;  %v1963_v55 = vld [vmem:[%s1847_s19 + $0x70] sm:$0xff] }
  0x17   : > { %880 = vmatpush.bf16.msrb.mxu2 %v1662_v23  ;;  %1517 = vmatmul.msk.bf16.vlgmr.msra.gmra.mxu3 %vm425_vm0, %v1928_v32  ;;  %v1941_v37 = vperm.slane %v1938_v34, 0  ;;  %v1667_v56 = vld [vmem:[%s2286_s3 + $0x60] sm:$0xff]  ;;  %v1666_v5 = vld [vmem:[%s2286_s3 + $0x58] sm:$0xff] }
  0x18   : > { %969 = vmatpush.bf16.msrb.mxu3 %v1670_v33  ;;  %v1982_v8 = vld [vmem:[%s1847_s19 + $0x78] sm:$0xff] }
  0x1a   : > { %570 = vmatpush.bf16.msrb.mxu1 %v1496_v13 }
  0x1b   : > { %881 = vmatpush.bf16.msrb.mxu2 %v1661_v24 }
  0x1c   : > { %970 = vmatpush.bf16.msrb.mxu3 %v1669_v39 }
  0x1f   : > { %882 = vmatpush.bf16.msrb.mxu2 %v1660_v26 }
  0x20   : > { %971 = vmatpush.bf16.msrb.mxu3 %v1668_v52 }
  0x23   : > { %883 = vmatpush.bf16.msrb.mxu2 %v1659_v27 }
  0x24   : > { %972 = vmatpush.bf16.msrb.mxu3 %v1667_v56 }
  0x25   : > { %1506 = vmatmul.msk.bf16.gmra.mxu0 %vm425_vm0, %v1636_v14  ;;  %1511 = vmatmul.msk.bf16.gmra.mxu1 %vm425_vm0, %v1864_v15 }
  0x26   : > { %1516 = vmatmul.msk.bf16.gmra.mxu2 %vm425_vm0, %v1903_v25 }
  0x27   : > { %884 = vmatpush.bf16.msrb.mxu2 %v1658_v28  ;;  %1518 = vmatmul.msk.bf16.gmra.mxu3 %vm425_vm0, %v1945_v38  ;;  %v1664_v28 = vld [vmem:[%s2286_s3 + $0x48] sm:$0xff] }
  0x28   : > { %973 = vmatpush.bf16.msrb.mxu3 %v1666_v5 }
  0x2b   : > { %885 = vmatpush.bf16.msrb.mxu2 %v1657_v29 }
  0x2f   : > { %886 = vmatpush.bf16.msrb.mxu2 %v1656_v30 }
  0x33   : > { %887 = vmatpush.bf16.msrb.mxu2 %v1655_v31  ;;  %v1663_v31 = vld [vmem:[%s2286_s3 + $0x40] sm:$0xff] }
  0x35   : > { %1507 = vmatmul.msk.bf16.gmra.mxu0 %vm425_vm0, %v1637_v16  ;;  %1512 = vmatmul.msk.bf16.gmra.mxu1 %vm425_vm0, %v1871_v17 }
  0x37   : > { %1519 = vmatmul.msk.bf16.gmra.mxu3 %vm425_vm0, %v1963_v55 }
  0x45   : > { %1508 = vmatmul.msk.bf16.gmra.mxu0 %vm425_vm0, %v1638_v18  ;;  %1513 = vmatmul.msk.bf16.gmra.mxu1 %vm425_vm0, %v1878_v19 }
  0x47   : > { %1520 = vmatmul.msk.bf16.gmra.mxu3 %vm425_vm0, %v1982_v8 }
  0x55   : > { %1509 = vmatmul.msk.bf16.gmra.mxu0 %vm425_vm0, %v1639_v20  ;;  %1514 = vmatmul.msk.bf16.gmra.mxu1 %vm425_vm0, %v1885_v21 }
  0x65   : > { %1521 = vmatmul.msk.bf16.vlgmr.msrb.gmra.mxu1 %vm425_vm0, %v1635_v9  ;;  %v1665_v9 = vld [vmem:[%s2286_s3 + $0x50] sm:$0xff] }
  0x66   : > { %974 = vmatpush.bf16.msrb.mxu3 %v1665_v9 }
  0x6a   : > { %975 = vmatpush.bf16.msrb.mxu3 %v1664_v28 }
  0x6e   : > { %976 = vmatpush.bf16.msrb.mxu3 %v1663_v31 }
  0x75   : > { %1522 = vmatmul.msk.bf16.gmra.mxu1 %vm425_vm0, %v1636_v14 }
  0x85   : > { %1523 = vmatmul.msk.bf16.gmra.mxu1 %vm425_vm0, %v1637_v16 }
  0x92   : > { %v483_v35 = vpop.f32.mrf.mxu0  ;;  %v508_v36 = vpop.f32.mrf.mxu1 }
  0x93   : > { %v484_v40 = vadd.f32 %v483_v35, %v1941_v37  ;;  %v509_v41 = vadd.f32 %v508_v36, %v1941_v37 }
  0x95   : > { %1524 = vmatmul.msk.bf16.gmra.mxu1 %vm425_vm0, %v1638_v18  ;;  %v652_v44 = vmax.f32 %v484_v40, 0.0  ;;  %v672_v47 = vmax.f32 %v509_v41, 0.0 }
  0x9a   : > { %v485_v42 = vpop.f32.mrf.mxu0  ;;  %v510_v43 = vpop.f32.mrf.mxu1 }
  0x9b   : > { %v486_v45 = vadd.f32 %v485_v42, %v1941_v37  ;;  %v511_v46 = vadd.f32 %v510_v43, %v1941_v37 }
  0x9d   : > { %v654_v48 = vmax.f32 %v486_v45, 0.0  ;;  %v674_v49 = vmax.f32 %v511_v46, 0.0 }
  0x9f   : > { %v716_v50 = vpack.c.bf16 %v654_v48, %v652_v44  ;;  %v1956_v51 = vpack.c.bf16 %v674_v49, %v672_v47 }
  0xa1   : > { %888 = vmatmul.bf16.vlgmr.msrb.gmra.mxu2 %v716_v50 }
  0xa2   : > { %v488_v53 = vpop.f32.mrf.mxu0  ;;  %v513_v54 = vpop.f32.mrf.mxu1 }
  0xa3   : > { %v489_v57 = vadd.f32 %v488_v53, %v1941_v37  ;;  %v514_v58 = vadd.f32 %v513_v54, %v1941_v37 }
  0xa5   : > { %1525 = vmatmul.msk.bf16.gmra.mxu1 %vm425_vm0, %v1639_v20  ;;  %v656_v61 = vmax.f32 %v489_v57, 0.0  ;;  %v676_v0 = vmax.f32 %v514_v58, 0.0 }
  0xaa   : > { %v490_v59 = vpop.f32.mrf.mxu0  ;;  %v515_v60 = vpop.f32.mrf.mxu1 }
  0xab   : > { %v491_v62 = vadd.f32 %v490_v59, %v1941_v37  ;;  %v516_v63 = vadd.f32 %v515_v60, %v1941_v37 }
  0xad   : > { %v658_v1 = vmax.f32 %v491_v62, 0.0  ;;  %v678_v2 = vmax.f32 %v516_v63, 0.0 }
  0xaf   : > { %v718_v3 = vpack.c.bf16 %v658_v1, %v656_v61  ;;  %v1974_v4 = vpack.c.bf16 %v678_v2, %v676_v0 }
  0xb1   : > { %893 = vmatmul.bf16.gmra.mxu2 %v718_v3 }
  0xb2   : > { %v493_v6 = vpop.f32.mrf.mxu0  ;;  %v518_v7 = vpop.f32.mrf.mxu1 }
  0xb3   : > { %v494_v11 = vadd.f32 %v493_v6, %v1941_v37  ;;  %v519_v12 = vadd.f32 %v518_v7, %v1941_v37 }
  0xb5   : > { %1526 = vmatmul.msk.bf16.gmra.mxu1 %vm425_vm0, %v1851_v10  ;;  %v660_v16 = vmax.f32 %v494_v11, 0.0  ;;  %v680_v20 = vmax.f32 %v519_v12, 0.0 }
  0xba   : > { %v495_v13 = vpop.f32.mrf.mxu0  ;;  %v520_v14 = vpop.f32.mrf.mxu1 }
  0xbb   : > { %v496_v18 = vadd.f32 %v495_v13, %v1941_v37  ;;  %v521_v10 = vadd.f32 %v520_v14, %v1941_v37 }
  0xbd   : > { %v662_v23 = vmax.f32 %v496_v18, 0.0  ;;  %v682_v24 = vmax.f32 %v521_v10, 0.0 }
  0xbf   : > { %v720_v26 = vpack.c.bf16 %v662_v23, %v660_v16  ;;  %v1993_v27 = vpack.c.bf16 %v682_v24, %v680_v20  ;;  %v533_v16 = vpop.f32.mrf.mxu2 }
  0xc1   : > { %898 = vmatmul.bf16.gmra.mxu2 %v720_v26 }
  0xc2   : > { %v498_v29 = vpop.f32.mrf.mxu0  ;;  %v523_v30 = vpop.f32.mrf.mxu1 }
  0xc3   : > { %v499_v33 = vadd.f32 %v498_v29, %v1941_v37  ;;  %v524_v35 = vadd.f32 %v523_v30, %v1941_v37 }
  0xc5   : > { %1527 = vmatmul.msk.bf16.gmra.mxu1 %vm425_vm0, %v1864_v15  ;;  %v664_v40 = vmax.f32 %v499_v33, 0.0  ;;  %v684_v43 = vmax.f32 %v524_v35, 0.0 }
  0xc7   : > { %v535_v26 = vpop.f32.mrf.mxu2 }
  0xca   : > { %v500_v36 = vpop.f32.mrf.mxu0  ;;  %v525_v39 = vpop.f32.mrf.mxu1 }
  0xcb   : > { %v501_v41 = vadd.f32 %v500_v36, %v1941_v37  ;;  %v526_v42 = vadd.f32 %v525_v39, %v1941_v37 }
  0xcd   : > { %v666_v44 = vmax.f32 %v501_v41, 0.0  ;;  %v686_v45 = vmax.f32 %v526_v42, 0.0 }
  0xcf   : > { %v722_v15 = vpack.c.bf16 %v666_v44, %v664_v40  ;;  %v732_v46 = vpack.c.bf16 %v686_v45, %v684_v43  ;;  %v538_v31 = vpop.f32.mrf.mxu2 }
  0xd1   : > { %903 = vmatmul.bf16.gmra.mxu2 %v722_v15 }
  0xd2   : > { %v503_v47 = vpop.f32.mrf.mxu0  ;;  %v528_v48 = vpop.f32.mrf.mxu1 }
  0xd3   : > { %v504_v49 = vadd.f32 %v503_v47, %v1941_v37  ;;  %v529_v50 = vadd.f32 %v528_v48, %v1941_v37  ;;  %v536_v47 = vadd.f32 %v535_v26, %v1941_v37  ;;  %v1677_v48 = vld [vmem:[%s2288_s5 + $0x30] sm:$0xff] }
  0xd5   : > { %1528 = vmatmul.msk.bf16.gmra.mxu1 %vm425_vm0, %v1871_v17  ;;  %v668_v54 = vmax.f32 %v504_v49, 0.0  ;;  %v688_v58 = vmax.f32 %v529_v50, 0.0  ;;  %v2014_v17 = vperm.slane %v1938_v34, 1  ;;  %v694_v50 = vmax.f32 %v536_v47, 0.0 }
  0xd7   : > { %v540_v36 = vpop.f32.mrf.mxu2 }
  0xda   : > { %v505_v52 = vpop.f32.mrf.mxu0  ;;  %v530_v53 = vpop.f32.mrf.mxu1 }
  0xdb   : > { %v506_v56 = vadd.f32 %v505_v52, %v1941_v37  ;;  %v531_v57 = vadd.f32 %v530_v53, %v1941_v37 }
  0xdd   : > { %v670_v59 = vmax.f32 %v506_v56, 0.0  ;;  %v690_v60 = vmax.f32 %v531_v57, 0.0 }
  0xdf   : > { %v724_v61 = vpack.c.bf16 %v670_v59, %v668_v54  ;;  %v734_v62 = vpack.c.bf16 %v690_v60, %v688_v58  ;;  %v1676_v60 = vld [vmem:[%s2288_s5 + $0x28] sm:$0xff] }
  0xe1   : > { %908 = vmatmul.bf16.gmra.mxu2 %v724_v61 }
  0xe2   : > { %v572_v63 = vpop.f32.mrf.mxu1 }
  0xe3   : > { %v573_v0 = vadd.f32 %v572_v63, %v2014_v17 }
  0xe5   : > { %1529 = vmatmul.msk.bf16.gmra.mxu1 %vm425_vm0, %v1878_v19  ;;  %v653_v3 = vmax.f32 %v573_v0, 0.0  ;;  %v539_v0 = vadd.f32 %v538_v31, %v1941_v37  ;;  %v1671_v31 = vld [vmem:[%s2288_s5] sm:$0xff] }
  0xea   : > { %v574_v1 = vpop.f32.mrf.mxu1 }
  0xeb   : > { %v575_v2 = vadd.f32 %v574_v1, %v2014_v17  ;;  %v541_v1 = vadd.f32 %v540_v36, %v1941_v37 }
  0xed   : > { %v655_v5 = vmax.f32 %v575_v2, 0.0  ;;  %v1675_v2 = vld [vmem:[%s2288_s5 + $0x20] sm:$0xff] }
  0xef   : > { %v717_v6 = vpack.c.bf16 %v655_v5, %v653_v3  ;;  %v696_v5 = vmax.f32 %v539_v0, 0.0 }
  0xf1   : > { %913 = vmatmul.bf16.gmra.mxu2 %v1956_v51  ;;  %977 = vmatmul.bf16.vlgmr.msrb.gmra.mxu3 %v717_v6  ;;  %v698_v6 = vmax.f32 %v541_v1, 0.0 }
  0xf2   : > { %v577_v7 = vpop.f32.mrf.mxu1 }
  0xf3   : > { %v578_v34 = vadd.f32 %v577_v7, %v2014_v17 }
  0xf5   : > { %1530 = vmatmul.msk.bf16.gmra.mxu1 %vm425_vm0, %v1885_v21  ;;  %v657_v11 = vmax.f32 %v578_v34, 0.0 }
  0xfa   : > { %v579_v9 = vpop.f32.mrf.mxu1 }
  0xfb   : > { %v580_v19 = vadd.f32 %v579_v9, %v2014_v17 }
  0xfd   : > { %v659_v12 = vmax.f32 %v580_v19, 0.0 }
  0xff   : > { %v719_v13 = vpack.c.bf16 %v659_v12, %v657_v11  ;;  %v738_v12 = vpack.c.bf16 %v698_v6, %v696_v5 }
 0x101   : > { %918 = vmatmul.bf16.gmra.mxu2 %v1974_v4  ;;  %982 = vmatmul.bf16.gmra.mxu3 %v719_v13 }
 0x102   : > { %v582_v14 = vpop.f32.mrf.mxu1 }
 0x103   : > { %v583_v51 = vadd.f32 %v582_v14, %v2014_v17 }
 0x105   : > { %1531 = vmatmul.msk.bf16.gmra.mxu1 %vm425_vm0, %v1891_v22  ;;  %v661_v10 = vmax.f32 %v583_v51, 0.0  ;;  %v1674_v51 = vld [vmem:[%s2288_s5 + $0x18] sm:$0xff] }
 0x10a   : > { %v584_v18 = vpop.f32.mrf.mxu1 }
 0x10b   : > { %v585_v21 = vadd.f32 %v584_v18, %v2014_v17  ;;  %v1673_v18 = vld [vmem:[%s2288_s5 + $0x10] sm:$0xff] }
 0x10d   : > { %v663_v20 = vmax.f32 %v585_v21, 0.0 }
 0x10f   : > { %v721_v23 = vpack.c.bf16 %v663_v20, %v661_v10 }
 0x111   : > { %923 = vmatmul.bf16.gmra.mxu2 %v1993_v27  ;;  %987 = vmatmul.bf16.gmra.mxu3 %v721_v23  ;;  %v1678_v27 = vld [vmem:[%s2288_s5 + $0x38] sm:$0xff] }
 0x112   : > { %v587_v24 = vpop.f32.mrf.mxu1  ;;  %1174 = vmatpush.bf16.msrb.mxu0 %v1678_v27  ;;  %1685 = vmatpush.bf16.msra.mxu2 %v1678_v27 }
 0x113   : > { %v588_v4 = vadd.f32 %v587_v24, %v2014_v17 }
 0x115   : > { %1532 = vmatmul.msk.bf16.gmra.mxu1 %vm425_vm0, %v1903_v25  ;;  %v665_v29 = vmax.f32 %v588_v4, 0.0  ;;  %v2040_v25 = vpop.f32.mrf.mxu3 }
 0x116   : > { %1175 = vmatpush.bf16.msrb.mxu0 %v1677_v48  ;;  %1686 = vmatpush.bf16.msra.mxu2 %v1677_v48  ;;  %v544_v21 = vadd.f32 %v2040_v25, %v1941_v37 }
 0x118   : > { %v700_v4 = vmax.f32 %v544_v21, 0.0 }
 0x11a   : > { %v589_v22 = vpop.f32.mrf.mxu1  ;;  %1176 = vmatpush.bf16.msrb.mxu0 %v1676_v60  ;;  %1687 = vmatpush.bf16.msra.mxu2 %v1676_v60 }
 0x11b   : > { %v590_v28 = vadd.f32 %v589_v22, %v2014_v17 }
 0x11d   : > { %v667_v30 = vmax.f32 %v590_v28, 0.0  ;;  %v545_v45 = vpop.f32.mrf.mxu3 }
 0x11e   : > { %1177 = vmatpush.bf16.msrb.mxu0 %v1675_v2  ;;  %1688 = vmatpush.bf16.msra.mxu2 %v1675_v2  ;;  %v546_v10 = vadd.f32 %v545_v45, %v1941_v37 }
 0x11f   : > { %v723_v33 = vpack.c.bf16 %v667_v30, %v665_v29 }
 0x120   : > { %v702_v22 = vmax.f32 %v546_v10, 0.0 }
 0x121   : > { %928 = vmatmul.bf16.gmra.mxu2 %v732_v46  ;;  %992 = vmatmul.bf16.gmra.mxu3 %v723_v33  ;;  %v534_v46 = vadd.f32 %v533_v16, %v1941_v37 }
 0x122   : > { %v592_v35 = vpop.f32.mrf.mxu1  ;;  %1178 = vmatpush.bf16.msrb.mxu0 %v1674_v51  ;;  %1689 = vmatpush.bf16.msra.mxu2 %v1674_v51  ;;  %v740_v33 = vpack.c.bf16 %v702_v22, %v700_v4 }
 0x123   : > { %v593_v39 = vadd.f32 %v592_v35, %v2014_v17  ;;  %v692_v49 = vmax.f32 %v534_v46, 0.0 }
 0x125   : > { %1533 = vmatmul.msk.bf16.gmra.mxu1 %vm425_vm0, %v1928_v32  ;;  %v669_v42 = vmax.f32 %v593_v39, 0.0  ;;  %v2044_v32 = vpop.f32.mrf.mxu2  ;;  %v2054_v54 = vpop.f32.mrf.mxu3 }
 0x126   : > { %1179 = vmatpush.bf16.msrb.mxu0 %v1673_v18  ;;  %1690 = vmatpush.bf16.msra.mxu2 %v1673_v18  ;;  %v549_v39 = vadd.f32 %v2054_v54, %v1941_v37  ;;  %v2108_v54 = vld [vmem:[%s2287_s4] ss:$0 sm:$0xff] }
 0x12a   : > { %v594_v40 = vpop.f32.mrf.mxu1 }
 0x12b   : > { %v595_v41 = vadd.f32 %v594_v40, %v2014_v17 }
 0x12d   : > { %v671_v43 = vmax.f32 %v595_v41, 0.0  ;;  %v2057_v57 = vpop.f32.mrf.mxu2  ;;  %v550_v63 = vpop.f32.mrf.mxu3 }
 0x12e   : > { %v551_v40 = vadd.f32 %v550_v63, %v1941_v37 }
 0x12f   : > { %v725_v44 = vpack.c.bf16 %v671_v43, %v669_v42  ;;  %v704_v43 = vmax.f32 %v549_v39, 0.0 }
 0x131   : > { %933 = vmatmul.bf16.gmra.mxu2 %v734_v62  ;;  %997 = vmatmul.bf16.gmra.mxu3 %v725_v44  ;;  %v706_v44 = vmax.f32 %v551_v40, 0.0 }
 0x132   : > { %v597_v15 = vpop.f32.mrf.mxu1 }
 0x133   : > { %v598_v52 = vadd.f32 %v597_v15, %v2014_v17 }
 0x135   : > { %1534 = vmatmul.msk.bf16.gmra.mxu1 %vm425_vm0, %v1945_v38  ;;  %v673_v58 = vmax.f32 %v598_v52, 0.0  ;;  %v736_v38 = vpack.c.bf16 %v694_v50, %v692_v49  ;;  %v2069_v3 = vpop.f32.mrf.mxu2  ;;  %v553_v13 = vpop.f32.mrf.mxu3  ;;  %v742_v50 = vpack.c.bf16 %v706_v44, %v704_v43 }
 0x136   : > { %v895_v18 = vadd.f32 %v2108_v54, %v2069_v3 }
 0x13a   : > { %v599_v53 = vpop.f32.mrf.mxu1 }
 0x13b   : > { %v600_v56 = vadd.f32 %v599_v53, %v2014_v17 }
 0x13d   : > { %v675_v59 = vmax.f32 %v600_v56, 0.0  ;;  %v2073_v14 = vpop.f32.mrf.mxu2  ;;  %v555_v20 = vpop.f32.mrf.mxu3  ;;  %v554_v56 = vadd.f32 %v553_v13, %v1941_v37 }
 0x13e   : > { %v897_v10 = vadd.f32 %v2108_v54, %v2073_v14 }
 0x13f   : > { %v727_v61 = vpack.c.bf16 %v675_v59, %v673_v58  ;;  %v556_v58 = vadd.f32 %v555_v20, %v1941_v37  ;;  %v708_v63 = vmax.f32 %v554_v56, 0.0 }
 0x141   : > { %938 = vmatmul.bf16.gmra.mxu2 %v736_v38  ;;  %1002 = vmatmul.bf16.gmra.mxu3 %v727_v61  ;;  %v890_v38 = vadd.f32 %v2108_v54, %v2044_v32  ;;  %v892_v61 = vadd.f32 %v2108_v54, %v2057_v57  ;;  %v710_v0 = vmax.f32 %v556_v58, 0.0 }
 0x142   : > { %v602_v62 = vpop.f32.mrf.mxu1 }
 0x143   : > { %v603_v7 = vadd.f32 %v602_v62, %v2014_v17 }
 0x145   : > { %1535 = vmatmul.msk.bf16.gmra.mxu1 %vm425_vm0, %v1963_v55  ;;  %v677_v19 = vmax.f32 %v603_v7, 0.0  ;;  %v2087_v24 = vpop.f32.mrf.mxu2  ;;  %v558_v27 = vpop.f32.mrf.mxu3 }
 0x146   : > { %v559_v51 = vadd.f32 %v558_v27, %v1941_v37  ;;  %v900_v40 = vadd.f32 %v2108_v54, %v2087_v24 }
 0x14a   : > { %v604_v34 = vpop.f32.mrf.mxu1 }
 0x14b   : > { %v605_v9 = vadd.f32 %v604_v34, %v2014_v17 }
 0x14d   : > { %v679_v11 = vmax.f32 %v605_v9, 0.0  ;;  %v2096_v36 = vpop.f32.mrf.mxu2  ;;  %v560_v15 = vpop.f32.mrf.mxu3 }
 0x14e   : > { %v902_v43 = vadd.f32 %v2108_v54, %v2096_v36 }
 0x14f   : > { %v729_v55 = vpack.c.bf16 %v679_v11, %v677_v19 }
 0x151   : > { %943 = vmatmul.bf16.gmra.mxu2 %v738_v12  ;;  %1007 = vmatmul.bf16.gmra.mxu3 %v729_v55  ;;  %v744_v12 = vpack.c.bf16 %v710_v0, %v708_v63 }
 0x152   : > { %v607_v16 = vpop.f32.mrf.mxu1 }
 0x153   : > { %v608_v23 = vadd.f32 %v607_v16, %v2014_v17  ;;  %v561_v16 = vadd.f32 %v560_v15, %v1941_v37 }
 0x155   : > { %1536 = vmatmul.msk.bf16.gmra.mxu1 %vm425_vm0, %v1982_v8  ;;  %v1672_v8 = vld [vmem:[%s2288_s5 + $0x8] sm:$0xff]  ;;  %v681_v29 = vmax.f32 %v608_v23, 0.0  ;;  %v2103_v48 = vpop.f32.mrf.mxu2  ;;  %v712_v23 = vmax.f32 %v559_v51, 0.0 }
 0x156   : > { %1180 = vmatpush.bf16.msrb.mxu0 %v1672_v8  ;;  %1691 = vmatpush.bf16.msra.mxu2 %v1672_v8 }
 0x15a   : > { %v609_v26 = vpop.f32.mrf.mxu1  ;;  %1181 = vmatpush.bf16.msrb.mxu0 %v1671_v31  ;;  %1692 = vmatpush.bf16.msra.mxu2 %v1671_v31 }
 0x15b   : > { %v610_v28 = vadd.f32 %v609_v26, %v2014_v17  ;;  %v714_v26 = vmax.f32 %v561_v16, 0.0 }
 0x15d   : > { %v683_v30 = vmax.f32 %v610_v28, 0.0  ;;  %v2112_v59 = vpop.f32.mrf.mxu2  ;;  %v746_v3 = vpack.c.bf16 %v714_v26, %v712_v23 }
 0x15e   : > { %v907_v63 = vadd.f32 %v2108_v54, %v2112_v59 }
 0x15f   : > { %v731_v35 = vpack.c.bf16 %v683_v30, %v681_v29 }
 0x161   : > { %948 = vmatmul.bf16.gmra.mxu2 %v740_v33  ;;  %1012 = vmatmul.bf16.gmra.mxu3 %v731_v35 }
 0x162   : > { %v612_v25 = vpop.f32.mrf.mxu1 }
 0x163   : > { %v613_v41 = vadd.f32 %v612_v25, %v2014_v17 }
 0x165   : > { %v685_v46 = vmax.f32 %v613_v41, 0.0  ;;  %v2120_v13 = vpop.f32.mrf.mxu2 }
 0x16a   : > { %v614_v42 = vpop.f32.mrf.mxu1 }
 0x16b   : > { %v615_v45 = vadd.f32 %v614_v42, %v2014_v17 }
 0x16d   : > { %v687_v47 = vmax.f32 %v615_v45, 0.0  ;;  %v911_v22 = vpop.f32.mrf.mxu2 }
 0x16e   : > { %v912_v51 = vadd.f32 %v2108_v54, %v911_v22 }
 0x16f   : > { %v733_v49 = vpack.c.bf16 %v687_v47, %v685_v46 }
 0x171   : > { %953 = vmatmul.bf16.gmra.mxu2 %v742_v50  ;;  %1017 = vmatmul.bf16.gmra.mxu3 %v733_v49 }
 0x172   : > { %v617_v52 = vpop.f32.mrf.mxu1 }
 0x173   : > { %v618_v60 = vadd.f32 %v617_v52, %v2014_v17 }
 0x174   : > { %v978_v53 = vpop.f32.mrf.mxu3 }
 0x175   : > { %v979_v1 = vadd.f32 %v978_v53, %v890_v38  ;;  %v689_v6 = vmax.f32 %v618_v60, 0.0  ;;  %v914_v39 = vpop.f32.mrf.mxu2  ;;  %v905_v60 = vadd.f32 %v2108_v54, %v2103_v48 }
 0x177   : > { %v1058_v9 = vmax.f32 %v979_v1, 0.0 }
 0x17a   : > { %v619_v62 = vpop.f32.mrf.mxu1 }
 0x17b   : > { %v620_v2 = vadd.f32 %v619_v62, %v2014_v17 }
 0x17c   : > { %v980_v5 = vpop.f32.mrf.mxu3 }
 0x17d   : > { %v691_v7 = vmax.f32 %v620_v2, 0.0  ;;  %v981_v34 = vadd.f32 %v980_v5, %v892_v61  ;;  %v916_v56 = vpop.f32.mrf.mxu2 }
 0x17f   : > { %v735_v19 = vpack.c.bf16 %v691_v7, %v689_v6  ;;  %v1059_v11 = vmax.f32 %v981_v34, 0.0 }
 0x181   : > { %958 = vmatmul.bf16.gmra.mxu2 %v744_v12  ;;  %1022 = vmatmul.bf16.gmra.mxu3 %v735_v19  ;;  %v1090_v32 = vpack.c.bf16 %v1059_v11, %v1058_v9 }
 0x182   : > { %v622_v57 = vpop.f32.mrf.mxu1 }
 0x183   : > { %1182 = vmatmul.bf16.vlgmr.msrb.gmra.mxu0 %v1090_v32  ;;  %v623_v21 = vadd.f32 %v622_v57, %v2014_v17  ;;  %v910_v57 = vadd.f32 %v2108_v54, %v2120_v13 }
 0x184   : > { %v983_v55 = vpop.f32.mrf.mxu3 }
 0x185   : > { %v984_v8 = vadd.f32 %v983_v55, %v895_v18  ;;  %v693_v29 = vmax.f32 %v623_v21, 0.0  ;;  %v919_v61 = vpop.f32.mrf.mxu2 }
 0x187   : > { %v1060_v37 = vmax.f32 %v984_v8, 0.0 }
 0x18a   : > { %v624_v20 = vpop.f32.mrf.mxu1 }
 0x18b   : > { %v625_v4 = vadd.f32 %v624_v20, %v2014_v17 }
 0x18c   : > { %v985_v28 = vpop.f32.mrf.mxu3 }
 0x18d   : > { %v695_v30 = vmax.f32 %v625_v4, 0.0  ;;  %v986_v31 = vadd.f32 %v985_v28, %v897_v10  ;;  %v921_v12 = vpop.f32.mrf.mxu2 }
 0x18f   : > { %v737_v33 = vpack.c.bf16 %v695_v30, %v693_v29  ;;  %v1061_v35 = vmax.f32 %v986_v31, 0.0 }
 0x191   : > { %963 = vmatmul.bf16.gmra.mxu2 %v746_v3  ;;  %1027 = vmatmul.bf16.gmra.mxu3 %v737_v33  ;;  %v1091_v27 = vpack.c.bf16 %v1061_v35, %v1060_v37  ;;  %v915_v37 = vadd.f32 %v2108_v54, %v914_v39  ;;  %v917_v35 = vadd.f32 %v2108_v54, %v916_v56 }
 0x192   : > { %v627_v25 = vpop.f32.mrf.mxu1 }
 0x193   : > { %1187 = vmatmul.bf16.gmra.mxu0 %v1091_v27  ;;  %v628_v41 = vadd.f32 %v627_v25, %v2014_v17 }
 0x194   : > { %v988_v14 = vpop.f32.mrf.mxu3 }
 0x195   : > { %v989_v44 = vadd.f32 %v988_v14, %v900_v40  ;;  %v697_v46 = vmax.f32 %v628_v41, 0.0  ;;  %v924_v26 = vpop.f32.mrf.mxu2 }
 0x197   : > { %v1062_v50 = vmax.f32 %v989_v44, 0.0 }
 0x19a   : > { %v629_v42 = vpop.f32.mrf.mxu1 }
 0x19b   : > { %v630_v45 = vadd.f32 %v629_v42, %v2014_v17 }
 0x19c   : > { %v990_v15 = vpop.f32.mrf.mxu3 }
 0x19d   : > { %v699_v47 = vmax.f32 %v630_v45, 0.0  ;;  %v991_v49 = vadd.f32 %v990_v15, %v902_v43  ;;  %v926_v31 = vpop.f32.mrf.mxu2 }
 0x19f   : > { %v739_v52 = vpack.c.bf16 %v699_v47, %v697_v46  ;;  %v1063_v53 = vmax.f32 %v991_v49, 0.0  ;;  %v920_v47 = vadd.f32 %v2108_v54, %v919_v61 }
 0x1a1   : > { %1032 = vmatmul.bf16.gmra.mxu3 %v739_v52  ;;  %v1092_v58 = vpack.c.bf16 %v1063_v53, %v1062_v50  ;;  %v922_v52 = vadd.f32 %v2108_v54, %v921_v12 }
 0x1a2   : > { %v632_v24 = vpop.f32.mrf.mxu1 }
 0x1a3   : > { %1192 = vmatmul.bf16.gmra.mxu0 %v1092_v58  ;;  %v633_v36 = vadd.f32 %v632_v24, %v2014_v17 }
 0x1a4   : > { %v993_v38 = vpop.f32.mrf.mxu3 }
 0x1a5   : > { %v994_v0 = vadd.f32 %v993_v38, %v905_v60  ;;  %v701_v5 = vmax.f32 %v633_v36, 0.0  ;;  %v929_v15 = vpop.f32.mrf.mxu2 }
 0x1a7   : > { %v1064_v34 = vmax.f32 %v994_v0, 0.0 }
 0x1aa   : > { %v634_v62 = vpop.f32.mrf.mxu1 }
 0x1ab   : > { %v635_v1 = vadd.f32 %v634_v62, %v2014_v17 }
 0x1ac   : > { %v995_v2 = vpop.f32.mrf.mxu3 }
 0x1ad   : > { %v703_v6 = vmax.f32 %v635_v1, 0.0  ;;  %v996_v7 = vadd.f32 %v995_v2, %v907_v63  ;;  %v931_v58 = vpop.f32.mrf.mxu2 }
 0x1af   : > { %v741_v9 = vpack.c.bf16 %v703_v6, %v701_v5  ;;  %v1065_v19 = vmax.f32 %v996_v7, 0.0  ;;  %v925_v5 = vadd.f32 %v2108_v54, %v924_v26  ;;  %v927_v6 = vadd.f32 %v2108_v54, %v926_v31 }
 0x1b1   : > { %1037 = vmatmul.bf16.gmra.mxu3 %v741_v9  ;;  %v1093_v11 = vpack.c.bf16 %v1065_v19, %v1064_v34 }
 0x1b2   : > { %v637_v48 = vpop.f32.mrf.mxu1 }
 0x1b3   : > { %1197 = vmatmul.bf16.gmra.mxu0 %v1093_v11  ;;  %v638_v59 = vadd.f32 %v637_v48, %v2014_v17 }
 0x1b4   : > { %v998_v32 = vpop.f32.mrf.mxu3 }
 0x1b5   : > { %v999_v16 = vadd.f32 %v998_v32, %v910_v57  ;;  %v705_v10 = vmax.f32 %v638_v59, 0.0  ;;  %v934_v2 = vpop.f32.mrf.mxu2  ;;  %v930_v32 = vadd.f32 %v2108_v54, %v929_v15  ;;  %v932_v59 = vadd.f32 %v2108_v54, %v931_v58 }
 0x1b7   : > { %v1066_v8 = vmax.f32 %v999_v16, 0.0 }
 0x1ba   : > { %v639_v55 = vpop.f32.mrf.mxu1 }
 0x1bb   : > { %v640_v18 = vadd.f32 %v639_v55, %v2014_v17 }
 0x1bc   : > { %v1000_v21 = vpop.f32.mrf.mxu3 }
 0x1bd   : > { %v707_v20 = vmax.f32 %v640_v18, 0.0  ;;  %v1001_v23 = vadd.f32 %v1000_v21, %v912_v51  ;;  %v936_v11 = vpop.f32.mrf.mxu2  ;;  %v2162_v18 = vld [vmem:[%s2289_s6] ss:$0 sm:$0xff] }
 0x1bf   : > { %v743_v4 = vpack.c.bf16 %v707_v20, %v705_v10  ;;  %v1067_v28 = vmax.f32 %v1001_v23, 0.0 }
 0x1c1   : > { %1042 = vmatmul.bf16.gmra.mxu3 %v743_v4  ;;  %v1094_v29 = vpack.c.bf16 %v1067_v28, %v1066_v8 }
 0x1c2   : > { %v642_v30 = vpop.f32.mrf.mxu1 }
 0x1c3   : > { %1202 = vmatmul.bf16.gmra.mxu0 %v1094_v29  ;;  %v643_v22 = vadd.f32 %v642_v30, %v2014_v17  ;;  %v935_v30 = vadd.f32 %v2108_v54, %v934_v2 }
 0x1c4   : > { %v1003_v13 = vpop.f32.mrf.mxu3 }
 0x1c5   : > { %v1004_v3 = vadd.f32 %v1003_v13, %v915_v37  ;;  %v709_v14 = vmax.f32 %v643_v22, 0.0  ;;  %v939_v57 = vpop.f32.mrf.mxu2  ;;  %v937_v37 = vadd.f32 %v2108_v54, %v936_v11 }
 0x1c7   : > { %v1068_v42 = vmax.f32 %v1004_v3, 0.0 }
 0x1ca   : > { %v644_v33 = vpop.f32.mrf.mxu1 }
 0x1cb   : > { %v645_v27 = vadd.f32 %v644_v33, %v2014_v17 }
 0x1cc   : > { %v1005_v25 = vpop.f32.mrf.mxu3 }
 0x1cd   : > { %v711_v40 = vmax.f32 %v645_v27, 0.0  ;;  %v1006_v41 = vadd.f32 %v1005_v25, %v917_v35  ;;  %v941_v8 = vpop.f32.mrf.mxu2 }
 0x1cf   : > { %v745_v43 = vpack.c.bf16 %v711_v40, %v709_v14  ;;  %v1069_v44 = vmax.f32 %v1006_v41, 0.0 }
 0x1d1   : > { %1047 = vmatmul.bf16.gmra.mxu3 %v745_v43  ;;  %v1095_v45 = vpack.c.bf16 %v1069_v44, %v1068_v42 }
 0x1d2   : > { %v647_v46 = vpop.f32.mrf.mxu1 }
 0x1d3   : > { %1207 = vmatmul.bf16.gmra.mxu0 %v1095_v45  ;;  %v648_v49 = vadd.f32 %v647_v46, %v2014_v17 }
 0x1d4   : > { %v1008_v39 = vpop.f32.mrf.mxu3 }
 0x1d5   : > { %v1009_v53 = vadd.f32 %v1008_v39, %v920_v47  ;;  %v713_v38 = vmax.f32 %v648_v49, 0.0  ;;  %v944_v3 = vpop.f32.mrf.mxu2  ;;  %v940_v39 = vadd.f32 %v2108_v54, %v939_v57 }
 0x1d7   : > { %v1070_v62 = vmax.f32 %v1009_v53, 0.0 }
 0x1da   : > { %v649_v50 = vpop.f32.mrf.mxu1 }
 0x1db   : > { %v650_v56 = vadd.f32 %v649_v50, %v2014_v17  ;;  %v942_v50 = vadd.f32 %v2108_v54, %v941_v8 }
 0x1dc   : > { %v1010_v24 = vpop.f32.mrf.mxu3 }
 0x1dd   : > { %v715_v60 = vmax.f32 %v650_v56, 0.0  ;;  %v1011_v36 = vadd.f32 %v1010_v24, %v922_v52  ;;  %v946_v45 = vpop.f32.mrf.mxu2 }
 0x1df   : > { %v747_v63 = vpack.c.bf16 %v715_v60, %v713_v38  ;;  %v1071_v0 = vmax.f32 %v1011_v36, 0.0 }
 0x1e1   : > { %1052 = vmatmul.bf16.gmra.mxu3 %v747_v63  ;;  %v1096_v1 = vpack.c.bf16 %v1071_v0, %v1070_v62 }
 0x1e3   : > { %1212 = vmatmul.bf16.gmra.mxu0 %v1096_v1 }
 0x1e4   : > { %v1013_v61 = vpop.f32.mrf.mxu3 }
 0x1e5   : > { %v1014_v7 = vadd.f32 %v1013_v61, %v925_v5  ;;  %v949_v63 = vpop.f32.mrf.mxu2  ;;  %v945_v5 = vadd.f32 %v2108_v54, %v944_v3 }
 0x1e7   : > { %v1072_v9 = vmax.f32 %v1014_v7, 0.0 }
 0x1ec   : > { %v1015_v34 = vpop.f32.mrf.mxu3 }
 0x1ed   : > { %v1016_v17 = vadd.f32 %v1015_v34, %v927_v6  ;;  %v947_v34 = vadd.f32 %v2108_v54, %v946_v45 }
 0x1ef   : > { %v1073_v19 = vmax.f32 %v1016_v17, 0.0 }
 0x1f1   : > { %v1097_v48 = vpack.c.bf16 %v1073_v19, %v1072_v9  ;;  %v951_v9 = vpop.f32.mrf.mxu2 }
 0x1f3   : > { %1217 = vmatmul.bf16.gmra.mxu0 %v1097_v48 }
 0x1f4   : > { %v1018_v12 = vpop.f32.mrf.mxu3 }
 0x1f5   : > { %v1019_v55 = vadd.f32 %v1018_v12, %v930_v32 }
 0x1f7   : > { %v1074_v21 = vmax.f32 %v1019_v55, 0.0 }
 0x1fc   : > { %v1020_v51 = vpop.f32.mrf.mxu3 }
 0x1fd   : > { %v1021_v16 = vadd.f32 %v1020_v51, %v932_v59 }
 0x1ff   : > { %v1075_v10 = vmax.f32 %v1021_v16, 0.0 }
 0x200   : > { %v1183_v20 = vpop.f32.mrf.mxu0 }
 0x201   : > { %v1098_v23 = vpack.c.bf16 %v1075_v10, %v1074_v21  ;;  %v1184_v26 = vadd.f32 %v2162_v18, %v1183_v20  ;;  %v954_v21 = vpop.f32.mrf.mxu2 }
 0x203   : > { %1703 = vtanh.f32 %v1184_v26  ;;  %1222 = vmatmul.bf16.gmra.mxu0 %v1098_v23  ;;  %v950_v23 = vadd.f32 %v2108_v54, %v949_v63 }
 0x204   : > { %v1023_v4 = vpop.f32.mrf.mxu3 }
 0x205   : > { %v1024_v22 = vadd.f32 %v1023_v4, %v935_v30  ;;  %v952_v4 = vadd.f32 %v2108_v54, %v951_v9 }
 0x207   : > { %v1076_v27 = vmax.f32 %v1024_v22, 0.0 }
 0x208   : > { %v1185_v28 = vpop.f32.mrf.mxu0 }
 0x209   : > { %v1704_v29 = vpop.eup %1703  ;;  %v1186_v13 = vadd.f32 %v2162_v18, %v1185_v28 }
 0x20a   : > { %v1295_v31 = vmul.f32 2.0, %v1704_v29 }
 0x20b   : > { %1705 = vtanh.f32 %v1186_v13 }
 0x20c   : > { %1328 = vst.msk [vmem:[%s2170_s18] sm:$0xff] %vm1327_vm1, %v1295_v31  ;;  %v1025_v33 = vpop.f32.mrf.mxu3 }
 0x20d   : > { %v1026_v35 = vadd.f32 %v1025_v33, %v937_v37  ;;  %v956_v37 = vpop.f32.mrf.mxu2 }
 0x20e   : > { %v957_v45 = vadd.f32 %v2108_v54, %v956_v37 }
 0x20f   : > { %v1077_v25 = vmax.f32 %v1026_v35, 0.0 }
 0x210   : > { %v1188_v14 = vpop.f32.mrf.mxu0 }
 0x211   : > { %v1706_v40 = vpop.eup %1705  ;;  %v1099_v41 = vpack.c.bf16 %v1077_v25, %v1076_v27  ;;  %v1189_v42 = vadd.f32 %v2162_v18, %v1188_v14 }
 0x212   : > { %v1296_v43 = vmul.f32 2.0, %v1706_v40 }
 0x213   : > { %1707 = vtanh.f32 %v1189_v42  ;;  %1227 = vmatmul.bf16.gmra.mxu0 %v1099_v41  ;;  %v955_v41 = vadd.f32 %v2108_v54, %v954_v21 }
 0x214   : > { %1329 = vst.msk [vmem:[%s2170_s18 + $0x8] sm:$0xff] %vm1327_vm1, %v1296_v43  ;;  %v1028_v44 = vpop.f32.mrf.mxu3 }
 0x215   : > { %v1029_v52 = vadd.f32 %v1028_v44, %v940_v39  ;;  %v959_v43 = vpop.f32.mrf.mxu2 }
 0x217   : > { %v1078_v58 = vmax.f32 %v1029_v52, 0.0 }
 0x218   : > { %v1190_v15 = vpop.f32.mrf.mxu0 }
 0x219   : > { %v1708_v46 = vpop.eup %1707  ;;  %v1191_v47 = vadd.f32 %v2162_v18, %v1190_v15 }
 0x21a   : > { %v1297_v49 = vmul.f32 2.0, %v1708_v46 }
 0x21b   : > { %1709 = vtanh.f32 %v1191_v47 }
 0x21c   : > { %1330 = vst.msk [vmem:[%s2170_s18 + $0x10] sm:$0xff] %vm1327_vm1, %v1297_v49  ;;  %v1030_v53 = vpop.f32.mrf.mxu3 }
 0x21d   : > { %v1031_v56 = vadd.f32 %v1030_v53, %v942_v50 }
 0x21f   : > { %v1079_v24 = vmax.f32 %v1031_v56, 0.0 }
 0x220   : > { %v1193_v38 = vpop.f32.mrf.mxu0 }
 0x221   : > { %v1710_v60 = vpop.eup %1709  ;;  %v1100_v36 = vpack.c.bf16 %v1079_v24, %v1078_v58  ;;  %v1194_v62 = vadd.f32 %v2162_v18, %v1193_v38  ;;  %v961_v24 = vpop.f32.mrf.mxu2 }
 0x222   : > { %v1298_v0 = vmul.f32 2.0, %v1710_v60 }
 0x223   : > { %1711 = vtanh.f32 %v1194_v62  ;;  %1232 = vmatmul.bf16.gmra.mxu0 %v1100_v36  ;;  %v960_v62 = vadd.f32 %v2108_v54, %v959_v43 }
 0x224   : > { %1331 = vst.msk [vmem:[%s2170_s18 + $0x18] sm:$0xff] %vm1327_vm1, %v1298_v0  ;;  %v1033_v1 = vpop.f32.mrf.mxu3 }
 0x225   : > { %v1034_v17 = vadd.f32 %v1033_v1, %v945_v5  ;;  %v962_v1 = vadd.f32 %v2108_v54, %v961_v24 }
 0x227   : > { %v1080_v48 = vmax.f32 %v1034_v17, 0.0 }
 0x228   : > { %v1195_v61 = vpop.f32.mrf.mxu0 }
 0x229   : > { %v1712_v2 = vpop.eup %1711  ;;  %v1196_v6 = vadd.f32 %v2162_v18, %v1195_v61 }
 0x22a   : > { %v1299_v7 = vmul.f32 2.0, %v1712_v2 }
 0x22b   : > { %1713 = vtanh.f32 %v1196_v6  ;;  %v964_v6 = vpop.f32.mrf.mxu2 }
 0x22c   : > { %1332 = vst.msk [vmem:[%s2170_s18 + $0x20] sm:$0xff] %vm1327_vm1, %v1299_v7  ;;  %v1035_v19 = vpop.f32.mrf.mxu3 }
 0x22d   : > { %v1036_v11 = vadd.f32 %v1035_v19, %v947_v34 }
 0x22f   : > { %v1081_v12 = vmax.f32 %v1036_v11, 0.0 }
 0x230   : > { %v1198_v32 = vpop.f32.mrf.mxu0 }
 0x231   : > { %v1714_v57 = vpop.eup %1713  ;;  %v1101_v59 = vpack.c.bf16 %v1081_v12, %v1080_v48  ;;  %v1199_v55 = vadd.f32 %v2162_v18, %v1198_v32 }
 0x232   : > { %v1300_v51 = vmul.f32 2.0, %v1714_v57 }
 0x233   : > { %1715 = vtanh.f32 %v1199_v55  ;;  %1237 = vmatmul.bf16.gmra.mxu0 %v1101_v59  ;;  %v966_v32 = vpop.f32.mrf.mxu2  ;;  %v965_v55 = vadd.f32 %v2108_v54, %v964_v6 }
 0x234   : > { %1333 = vst.msk [vmem:[%s2170_s18 + $0x28] sm:$0xff] %vm1327_vm1, %v1300_v51  ;;  %v1038_v16 = vpop.f32.mrf.mxu3  ;;  %v967_v21 = vadd.f32 %v2108_v54, %v966_v32 }
 0x235   : > { %v1039_v28 = vadd.f32 %v1038_v16, %v950_v23 }
 0x237   : > { %v1082_v13 = vmax.f32 %v1039_v28, 0.0 }
 0x238   : > { %v1200_v10 = vpop.f32.mrf.mxu0 }
 0x239   : > { %v1716_v20 = vpop.eup %1715  ;;  %v1201_v26 = vadd.f32 %v2162_v18, %v1200_v10 }
 0x23a   : > { %v1301_v8 = vmul.f32 2.0, %v1716_v20 }
 0x23b   : > { %1717 = vtanh.f32 %v1201_v26 }
 0x23c   : > { %1334 = vst.msk [vmem:[%s2170_s18 + $0x30] sm:$0xff] %vm1327_vm1, %v1301_v8  ;;  %v1040_v29 = vpop.f32.mrf.mxu3 }
 0x23d   : > { %v1041_v30 = vadd.f32 %v1040_v29, %v952_v4 }
 0x23f   : > { %v1083_v31 = vmax.f32 %v1041_v30, 0.0 }
 0x240   : > { %v1203_v22 = vpop.f32.mrf.mxu0 }
 0x241   : > { %v1718_v33 = vpop.eup %1717  ;;  %v1102_v35 = vpack.c.bf16 %v1083_v31, %v1082_v13  ;;  %v1204_v3 = vadd.f32 %v2162_v18, %v1203_v22 }
 0x242   : > { %v1302_v27 = vmul.f32 2.0, %v1718_v33 }
 0x243   : > { %1719 = vtanh.f32 %v1204_v3  ;;  %1242 = vmatmul.bf16.gmra.mxu0 %v1102_v35 }
 0x244   : > { %1335 = vst.msk [vmem:[%s2170_s18 + $0x38] sm:$0xff] %vm1327_vm1, %v1302_v27  ;;  %v1043_v25 = vpop.f32.mrf.mxu3 }
 0x245   : > { %v1044_v15 = vadd.f32 %v1043_v25, %v955_v41 }
 0x247   : > { %v1084_v47 = vmax.f32 %v1044_v15, 0.0 }
 0x248   : > { %v1205_v14 = vpop.f32.mrf.mxu0 }
 0x249   : > { %v1720_v40 = vpop.eup %1719  ;;  %v1206_v42 = vadd.f32 %v2162_v18, %v1205_v14 }
 0x24a   : > { %v1303_v44 = vmul.f32 2.0, %v1720_v40 }
 0x24b   : > { %1721 = vtanh.f32 %v1206_v42 }
 0x24c   : > { %1336 = vst.msk [vmem:[%s2170_s18 + $0x40] sm:$0xff] %vm1327_vm1, %v1303_v44  ;;  %v1045_v46 = vpop.f32.mrf.mxu3 }
 0x24d   : > { %v1046_v39 = vadd.f32 %v1045_v46, %v957_v45 }
 0x24f   : > { %v1085_v49 = vmax.f32 %v1046_v39, 0.0 }
 0x250   : > { %v1208_v50 = vpop.f32.mrf.mxu0 }
 0x251   : > { %v1722_v52 = vpop.eup %1721  ;;  %v1103_v53 = vpack.c.bf16 %v1085_v49, %v1084_v47  ;;  %v1209_v56 = vadd.f32 %v2162_v18, %v1208_v50 }
 0x252   : > { %v1304_v58 = vmul.f32 2.0, %v1722_v52 }
 0x253   : > { %1723 = vtanh.f32 %v1209_v56  ;;  %1247 = vmatmul.bf16.gmra.mxu0 %v1103_v53 }
 0x254   : > { %1337 = vst.msk [vmem:[%s2170_s18 + $0x48] sm:$0xff] %vm1327_vm1, %v1304_v58  ;;  %v1048_v38 = vpop.f32.mrf.mxu3 }
 0x255   : > { %v1049_v61 = vadd.f32 %v1048_v38, %v960_v62 }
 0x257   : > { %v1086_v7 = vmax.f32 %v1049_v61, 0.0 }
 0x258   : > { %v1210_v60 = vpop.f32.mrf.mxu0 }
 0x259   : > { %v1724_v36 = vpop.eup %1723  ;;  %v1211_v63 = vadd.f32 %v2162_v18, %v1210_v60 }
 0x25a   : > { %v1305_v0 = vmul.f32 2.0, %v1724_v36 }
 0x25b   : > { %1725 = vtanh.f32 %v1211_v63 }
 0x25c   : > { %1338 = vst.msk [vmem:[%s2170_s18 + $0x50] sm:$0xff] %vm1327_vm1, %v1305_v0  ;;  %v1050_v2 = vpop.f32.mrf.mxu3 }
 0x25d   : > { %v1051_v5 = vadd.f32 %v1050_v2, %v962_v1 }
 0x25f   : > { %v1087_v34 = vmax.f32 %v1051_v5, 0.0 }
 0x260   : > { %v1213_v17 = vpop.f32.mrf.mxu0 }
 0x261   : > { %v1726_v9 = vpop.eup %1725  ;;  %v1104_v19 = vpack.c.bf16 %v1087_v34, %v1086_v7  ;;  %v1214_v11 = vadd.f32 %v2162_v18, %v1213_v17 }
 0x262   : > { %v1306_v48 = vmul.f32 2.0, %v1726_v9 }
 0x263   : > { %1727 = vtanh.f32 %v1214_v11  ;;  %1252 = vmatmul.bf16.gmra.mxu0 %v1104_v19 }
 0x264   : > { %1339 = vst.msk [vmem:[%s2170_s18 + $0x58] sm:$0xff] %vm1327_vm1, %v1306_v48  ;;  %v1053_v12 = vpop.f32.mrf.mxu3 }
 0x265   : > { %v1054_v10 = vadd.f32 %v1053_v12, %v965_v55 }
 0x267   : > { %v1088_v26 = vmax.f32 %v1054_v10, 0.0 }
 0x268   : > { %v1215_v57 = vpop.f32.mrf.mxu0 }
 0x269   : > { %v1728_v59 = vpop.eup %1727  ;;  %v1216_v51 = vadd.f32 %v2162_v18, %v1215_v57 }
 0x26a   : > { %v1307_v16 = vmul.f32 2.0, %v1728_v59 }
 0x26b   : > { %1729 = vtanh.f32 %v1216_v51 }
 0x26c   : > { %1340 = vst.msk [vmem:[%s2170_s18 + $0x60] sm:$0xff] %vm1327_vm1, %v1307_v16  ;;  %v1055_v20 = vpop.f32.mrf.mxu3 }
 0x26d   : > { %v1056_v23 = vadd.f32 %v1055_v20, %v967_v21 }
 0x26f   : > { %v1089_v8 = vmax.f32 %v1056_v23, 0.0 }
 0x270   : > { %v1218_v4 = vpop.f32.mrf.mxu0 }
 0x271   : > { %v1730_v28 = vpop.eup %1729  ;;  %v1105_v29 = vpack.c.bf16 %v1089_v8, %v1088_v26  ;;  %v1219_v30 = vadd.f32 %v2162_v18, %v1218_v4 }
 0x272   : > { %v1308_v13 = vmul.f32 2.0, %v1730_v28 }
 0x273   : > { %1731 = vtanh.f32 %v1219_v30  ;;  %1257 = vmatmul.bf16.vlgmr.msra.gmra.mxu2 %v1105_v29 }
 0x274   : > { %1341 = vst.msk [vmem:[%s2170_s18 + $0x68] sm:$0xff] %vm1327_vm1, %v1308_v13 }
 0x278   : > { %v1220_v54 = vpop.f32.mrf.mxu0 }
 0x279   : > { %v1732_v31 = vpop.eup %1731  ;;  %v1221_v37 = vadd.f32 %v2162_v18, %v1220_v54 }
 0x27a   : > { %v1309_v22 = vmul.f32 2.0, %v1732_v31 }
 0x27b   : > { %1733 = vtanh.f32 %v1221_v37 }
 0x27c   : > { %1342 = vst.msk [vmem:[%s2170_s18 + $0x70] sm:$0xff] %vm1327_vm1, %v1309_v22 }
 0x280   : > { %v1223_v33 = vpop.f32.mrf.mxu0 }
 0x281   : > { %v1734_v35 = vpop.eup %1733  ;;  %v1224_v3 = vadd.f32 %v2162_v18, %v1223_v33 }
 0x282   : > { %v1310_v27 = vmul.f32 2.0, %v1734_v35 }
 0x283   : > { %1735 = vtanh.f32 %v1224_v3 }
 0x284   : > { %1343 = vst.msk [vmem:[%s2170_s18 + $0x78] sm:$0xff] %vm1327_vm1, %v1310_v27 }
 0x288   : > { %v1225_v25 = vpop.f32.mrf.mxu0 }
 0x289   : > { %v1736_v14 = vpop.eup %1735  ;;  %v1226_v40 = vadd.f32 %v2162_v18, %v1225_v25 }
 0x28a   : > { %v1311_v41 = vmul.f32 2.0, %v1736_v14 }
 0x28b   : > { %1737 = vtanh.f32 %v1226_v40 }
 0x28c   : > { %1344 = vst.msk [vmem:[%s2170_s18 + $0x80] sm:$0xff] %vm1327_vm1, %v1311_v41 }
 0x290   : > { %v1228_v42 = vpop.f32.mrf.mxu0 }
 0x291   : > { %v1738_v43 = vpop.eup %1737  ;;  %v1229_v44 = vadd.f32 %v2162_v18, %v1228_v42 }
 0x292   : > { %v1312_v45 = vmul.f32 2.0, %v1738_v43 }
 0x293   : > { %1739 = vtanh.f32 %v1229_v44 }
 0x294   : > { %1345 = vst.msk [vmem:[%s2170_s18 + $0x88] sm:$0xff] %vm1327_vm1, %v1312_v45 }
 0x298   : > { %v1230_v15 = vpop.f32.mrf.mxu0 }
 0x299   : > { %v1740_v46 = vpop.eup %1739  ;;  %v1231_v39 = vadd.f32 %v2162_v18, %v1230_v15 }
 0x29a   : > { %v1313_v47 = vmul.f32 2.0, %v1740_v46 }
 0x29b   : > { %1741 = vtanh.f32 %v1231_v39 }
 0x29c   : > { %1346 = vst.msk [vmem:[%s2170_s18 + $0x90] sm:$0xff] %vm1327_vm1, %v1313_v47 }
 0x2a0   : > { %v1233_v49 = vpop.f32.mrf.mxu0 }
 0x2a1   : > { %v1742_v50 = vpop.eup %1741  ;;  %v1234_v52 = vadd.f32 %v2162_v18, %v1233_v49 }
 0x2a2   : > { %v1314_v53 = vmul.f32 2.0, %v1742_v50 }
 0x2a3   : > { %1743 = vtanh.f32 %v1234_v52 }
 0x2a4   : > { %1347 = vst.msk [vmem:[%s2170_s18 + $0x98] sm:$0xff] %vm1327_vm1, %v1314_v53 }
 0x2a8   : > { %v1235_v56 = vpop.f32.mrf.mxu0 }
 0x2a9   : > { %v1744_v58 = vpop.eup %1743  ;;  %v1236_v24 = vadd.f32 %v2162_v18, %v1235_v56 }
 0x2aa   : > { %v1315_v38 = vmul.f32 2.0, %v1744_v58 }
 0x2ab   : > { %1745 = vtanh.f32 %v1236_v24 }
 0x2ac   : > { %1348 = vst.msk [vmem:[%s2170_s18 + $0xa0] sm:$0xff] %vm1327_vm1, %v1315_v38 }
 0x2b0   : > { %v1238_v60 = vpop.f32.mrf.mxu0 }
 0x2b1   : > { %v1746_v36 = vpop.eup %1745  ;;  %v1239_v62 = vadd.f32 %v2162_v18, %v1238_v60 }
 0x2b2   : > { %v1316_v63 = vmul.f32 2.0, %v1746_v36 }
 0x2b3   : > { %1747 = vtanh.f32 %v1239_v62 }
 0x2b4   : > { %1349 = vst.msk [vmem:[%s2170_s18 + $0xa8] sm:$0xff] %vm1327_vm1, %v1316_v63 }
 0x2b8   : > { %v1240_v0 = vpop.f32.mrf.mxu0 }
 0x2b9   : > { %v1748_v1 = vpop.eup %1747  ;;  %v1241_v61 = vadd.f32 %v2162_v18, %v1240_v0 }
 0x2ba   : > { %v1317_v2 = vmul.f32 2.0, %v1748_v1 }
 0x2bb   : > { %1749 = vtanh.f32 %v1241_v61 }
 0x2bc   : > { %1350 = vst.msk [vmem:[%s2170_s18 + $0xb0] sm:$0xff] %vm1327_vm1, %v1317_v2 }
 0x2c0   : > { %v1243_v5 = vpop.f32.mrf.mxu0 }
 0x2c1   : > { %v1750_v6 = vpop.eup %1749  ;;  %v1244_v7 = vadd.f32 %v2162_v18, %v1243_v5 }
 0x2c2   : > { %v1318_v34 = vmul.f32 2.0, %v1750_v6 }
 0x2c3   : > { %1751 = vtanh.f32 %v1244_v7 }
 0x2c4   : > { %1351 = vst.msk [vmem:[%s2170_s18 + $0xb8] sm:$0xff] %vm1327_vm1, %v1318_v34 }
 0x2c8   : > { %v1245_v17 = vpop.f32.mrf.mxu0 }
 0x2c9   : > { %v1752_v9 = vpop.eup %1751  ;;  %v1246_v19 = vadd.f32 %v2162_v18, %v1245_v17 }
 0x2ca   : > { %v1319_v11 = vmul.f32 2.0, %v1752_v9 }
 0x2cb   : > { %1753 = vtanh.f32 %v1246_v19 }
 0x2cc   : > { %1352 = vst.msk [vmem:[%s2170_s18 + $0xc0] sm:$0xff] %vm1327_vm1, %v1319_v11 }
 0x2d0   : > { %v1248_v48 = vpop.f32.mrf.mxu0 }
 0x2d1   : > { %v1754_v12 = vpop.eup %1753  ;;  %v1249_v32 = vadd.f32 %v2162_v18, %v1248_v48 }
 0x2d2   : > { %v1320_v57 = vmul.f32 2.0, %v1754_v12 }
 0x2d3   : > { %1755 = vtanh.f32 %v1249_v32 }
 0x2d4   : > { %1353 = vst.msk [vmem:[%s2170_s18 + $0xc8] sm:$0xff] %vm1327_vm1, %v1320_v57 }
 0x2d8   : > { %v1250_v59 = vpop.f32.mrf.mxu0 }
 0x2d9   : > { %v1756_v55 = vpop.eup %1755  ;;  %v1251_v51 = vadd.f32 %v2162_v18, %v1250_v59 }
 0x2da   : > { %v1321_v16 = vmul.f32 2.0, %v1756_v55 }
 0x2db   : > { %1757 = vtanh.f32 %v1251_v51 }
 0x2dc   : > { %1354 = vst.msk [vmem:[%s2170_s18 + $0xd0] sm:$0xff] %vm1327_vm1, %v1321_v16 }
 0x2e0   : > { %v1253_v21 = vpop.f32.mrf.mxu0 }
 0x2e1   : > { %v1758_v10 = vpop.eup %1757  ;;  %v1254_v20 = vadd.f32 %v2162_v18, %v1253_v21 }
 0x2e2   : > { %v1322_v23 = vmul.f32 2.0, %v1758_v10 }
 0x2e3   : > { %1759 = vtanh.f32 %v1254_v20 }
 0x2e4   : > { %1355 = vst.msk [vmem:[%s2170_s18 + $0xd8] sm:$0xff] %vm1327_vm1, %v1322_v23 }
 0x2e8   : > { %v1255_v26 = vpop.f32.mrf.mxu0 }
 0x2e9   : > { %v1760_v8 = vpop.eup %1759  ;;  %v1256_v4 = vadd.f32 %v2162_v18, %v1255_v26 }
 0x2ea   : > { %v1323_v28 = vmul.f32 2.0, %v1760_v8 }
 0x2eb   : > { %1761 = vtanh.f32 %v1256_v4 }
 0x2ec   : > { %1356 = vst.msk [vmem:[%s2170_s18 + $0xe0] sm:$0xff] %vm1327_vm1, %v1323_v28 }
 0x2f1   : > { %v1762_v29 = vpop.eup %1761 }
 0x2f2   : > { %v1324_v30 = vmul.f32 2.0, %v1762_v29 }
 0x2f4   : > { %1357 = vst.msk [vmem:[%s2170_s18 + $0xe8] sm:$0xff] %vm1327_vm1, %v1324_v30 }
 0x2f6   : > { %v1258_v13 = vpop.f32.mrf.mxu2 }
 0x2f7   : > { %v1259_v54 = vadd.f32 %v2162_v18, %v1258_v13 }
 0x2f9   : > { %1763 = vtanh.f32 %v1259_v54 }
 0x2fe   : > { %v1260_v31 = vpop.f32.mrf.mxu2 }
 0x2ff   : > { %v1764_v37 = vpop.eup %1763  ;;  %v1261_v22 = vadd.f32 %v2162_v18, %v1260_v31 }
 0x300   : > { %v1325_v33 = vmul.f32 2.0, %v1764_v37 }
 0x301   : > { %1765 = vtanh.f32 %v1261_v22 }
 0x302   : > { %1358 = vst.msk [vmem:[%s2170_s18 + $0xf0] sm:$0xff] %vm1327_vm1, %v1325_v33 }
 0x307   : > { %v1766_v35 = vpop.eup %1765 }
 0x308   : > { %v1326_v3 = vmul.f32 2.0, %v1766_v35 }
 0x30a   : > { %1359 = vst.msk [vmem:[%s2170_s18 + $0xf8] sm:$0xff] %vm1327_vm1, %v1326_v3 }
 0x30b PF: > { %s17_s24 = sadd.s32 1, %s1773_s24  }
 0x30c   : > { %p14_p4 = scmp.ge.s32.totalorder %s17_s24, 4  }
 0x30e   :  { %16 = sbr.rel (!%p14_p4) target bundleno = 1 (0x1), region = 78 }

</bundles_post_ra>
